<compile_context>
chip_gen: v5e
topology: v5e:2x2
jax: 0.10.0
libtpu: 0.0.40
codegen_flags: <defaults>
</compile_context>

<pallas_src>
import jax
import jax.numpy as jnp
from jax.experimental import pallas as pl
from jax.experimental.pallas import tpu as pltpu

LANE = 128


def _conv1x1_kernel(x_ref, w_ref, b_ref, o_ref):
    # x_ref: (1, Cin, TR, 128)   w_ref: (Cout, Cin, 1, 128)
    # b_ref: (Cout, 1, 128)      o_ref: (1, Cout, TR, 128)
    cin = x_ref.shape[1]
    cout = o_ref.shape[1]
    for co in range(cout):
        acc = x_ref[0, 0, :, :].astype(jnp.float32) * w_ref[co, 0, :, :]
        for ci in range(1, cin):
            acc = acc + x_ref[0, ci, :, :].astype(jnp.float32) * w_ref[co, ci, :, :]
        o_ref[0, co, :, :] = (acc + b_ref[co, :, :]).astype(o_ref.dtype)


def _pick_tile_rows(rows_total, cin, cout,
                    vmem_budget_bytes=24 * 1024 * 1024, max_rows=512):
    """Rows (of 128 lanes) per grid step, sized for double-buffered VMEM."""
    bytes_per_row = (cin + cout) * LANE * 4 * 2     # f32, x2 double-buffering
    cap = max(8, vmem_budget_bytes // bytes_per_row)
    cap = min(cap, max_rows)
    if rows_total <= cap:
        return rows_total                            # full-dim block (always legal)
    return max(8, (cap // 8) * 8)                    # multiple of 8 for (8,128) tiling


def outconv_forward(x_nchw, weight, bias):
    """1x1 Conv2d with bias, matching nn.Conv2d(in_ch, out_ch, 1) on NCHW input.

    x_nchw: (N, Cin, H, W)
    weight: (Cout, Cin, 1, 1)   (PyTorch Conv2d weight layout)
    bias:   (Cout,)
    returns (N, Cout, H, W)
    """
    N, Cin, H, W = x_nchw.shape
    Cout = weight.shape[0]
    HW = H * W

    rows_total = pl.cdiv(HW, LANE)
    tile_rows = _pick_tile_rows(rows_total, Cin, Cout)
    rows_pad = pl.cdiv(rows_total, tile_rows) * tile_rows
    HW_pad = rows_pad * LANE

    # NCHW-native: (N, Cin, HW) is a free reshape; pad spatial axis if ragged.
    x3 = x_nchw.reshape(N, Cin, HW)
    if HW_pad != HW:
        x3 = jnp.pad(x3, ((0, 0), (0, 0), (0, HW_pad - HW)))
    x4 = x3.reshape(N, Cin, rows_pad, LANE)

    # Lane-broadcast weight rows / bias rows (tiny, built once outside the grid).
    w_lanes = jnp.broadcast_to(
        weight.reshape(Cout, Cin, 1, 1).astype(jnp.float32), (Cout, Cin, 1, LANE))
    b_lanes = jnp.broadcast_to(
        bias.reshape(Cout, 1, 1).astype(jnp.float32), (Cout, 1, LANE))

    grid = (N, rows_pad // tile_rows)

    out4 = pl.pallas_call(
        _conv1x1_kernel,
        out_shape=jax.ShapeDtypeStruct((N, Cout, rows_pad, LANE), x_nchw.dtype),
        grid=grid,
        in_specs=[
            pl.BlockSpec((1, Cin, tile_rows, LANE), lambda n, j: (n, 0, j, 0)),
            pl.BlockSpec((Cout, Cin, 1, LANE), lambda n, j: (0, 0, 0, 0)),
            pl.BlockSpec((Cout, 1, LANE), lambda n, j: (0, 0, 0)),
        ],
        out_specs=pl.BlockSpec((1, Cout, tile_rows, LANE), lambda n, j: (n, 0, j, 0)),
        compiler_params=pltpu.CompilerParams(
            dimension_semantics=("parallel", "parallel"),
            vmem_limit_bytes=32 * 1024 * 1024,
        ),
    )(x4, w_lanes, b_lanes)

    y3 = out4.reshape(N, Cout, HW_pad)
    if HW_pad != HW:
        y3 = y3[:, :, :HW]
    return y3.reshape(N, Cout, H, W)


if __name__ == "__main__":
    # Module: outconv(in_ch=4, out_ch=3)
    N, Cin, H, W = 2, 4, 16, 16
    Cout = 3

    key = jax.random.PRNGKey(0)
    kx, kw, kb = jax.random.split(key, 3)

    x = jax.random.normal(kx, (N, Cin, H, W), dtype=jnp.float32)
    bound = 1.0 / (Cin ** 0.5)
    weight = jax.random.uniform(kw, (Cout, Cin, 1, 1), dtype=jnp.float32,
                                minval=-bound, maxval=bound)
    bias = jax.random.uniform(kb, (Cout,), dtype=jnp.float32,
                              minval=-bound, maxval=bound)

    y = outconv_forward(x, weight, bias)
    y = jax.block_until_ready(y)

    # Reference: plain JAX einsum of the 1x1 conv.
    y_ref = jnp.einsum("nchw,oc->nohw", x, weight.reshape(Cout, Cin)) \
        + bias.reshape(1, Cout, 1, 1)
    assert y.shape == (N, Cout, H, W)
    assert jnp.allclose(y, y_ref, atol=1e-5, rtol=1e-5)

    print("KERNEL_OK")
</pallas_src>

<mosaic_0001>
module attributes {stable_mosaic.version = 11 : i64} {
  func.func @_conv1x1_kernel(%arg0: i32, %arg1: i32, %arg2: memref<1x4x2x128xf32, #tpu.memory_space<vmem>>, %arg3: memref<3x4x1x128xf32, #tpu.memory_space<vmem>>, %arg4: memref<3x1x128xf32, #tpu.memory_space<vmem>>, %arg5: memref<1x3x2x128xf32, #tpu.memory_space<vmem>>) attributes {dimension_semantics = [#tpu.dimension_semantics<parallel>, #tpu.dimension_semantics<parallel>], iteration_bounds = array<i64: 2, 1>, scalar_prefetch = 0 : i64, scratch_operands = 0 : i64, tpu.core_type = #tpu.core_type<tc>, window_params = [{transform_indices = @transform_0, window_bounds = array<i64: 1, 4, 2, 128>}, {pipeline_mode = #tpu.pipeline_mode<synchronous>, transform_indices = @transform_1, window_bounds = array<i64: 3, 4, 1, 128>}, {pipeline_mode = #tpu.pipeline_mode<synchronous>, transform_indices = @transform_2, window_bounds = array<i64: 3, 1, 128>}, {transform_indices = @transform_3, window_bounds = array<i64: 1, 3, 2, 128>}]} {
    %c0 = arith.constant 0 : index
    %c0_0 = arith.constant 0 : index
    %c0_1 = arith.constant 0 : index
    %c0_2 = arith.constant 0 : index
    %0 = vector.load %arg2[%c0, %c0_0, %c0_1, %c0_2] : memref<1x4x2x128xf32, #tpu.memory_space<vmem>>, vector<1x1x2x128xf32>
    %1 = vector.shape_cast %0 : vector<1x1x2x128xf32> to vector<2x128xf32>
    %c0_3 = arith.constant 0 : index
    %c0_4 = arith.constant 0 : index
    %c0_5 = arith.constant 0 : index
    %c0_6 = arith.constant 0 : index
    %2 = vector.load %arg3[%c0_3, %c0_4, %c0_5, %c0_6] : memref<3x4x1x128xf32, #tpu.memory_space<vmem>>, vector<1x1x1x128xf32>
    %3 = vector.shape_cast %2 : vector<1x1x1x128xf32> to vector<1x128xf32>
    %4 = vector.broadcast %3 : vector<1x128xf32> to vector<2x128xf32>
    %5 = arith.mulf %1, %4 : vector<2x128xf32>
    %c0_7 = arith.constant 0 : index
    %c1 = arith.constant 1 : index
    %c0_8 = arith.constant 0 : index
    %c0_9 = arith.constant 0 : index
    %6 = vector.load %arg2[%c0_7, %c1, %c0_8, %c0_9] : memref<1x4x2x128xf32, #tpu.memory_space<vmem>>, vector<1x1x2x128xf32>
    %7 = vector.shape_cast %6 : vector<1x1x2x128xf32> to vector<2x128xf32>
    %c0_10 = arith.constant 0 : index
    %c1_11 = arith.constant 1 : index
    %c0_12 = arith.constant 0 : index
    %c0_13 = arith.constant 0 : index
    %8 = vector.load %arg3[%c0_10, %c1_11, %c0_12, %c0_13] : memref<3x4x1x128xf32, #tpu.memory_space<vmem>>, vector<1x1x1x128xf32>
    %9 = vector.shape_cast %8 : vector<1x1x1x128xf32> to vector<1x128xf32>
    %10 = vector.broadcast %9 : vector<1x128xf32> to vector<2x128xf32>
    %11 = arith.mulf %7, %10 : vector<2x128xf32>
    %12 = arith.addf %5, %11 : vector<2x128xf32>
    %c0_14 = arith.constant 0 : index
    %c2 = arith.constant 2 : index
    %c0_15 = arith.constant 0 : index
    %c0_16 = arith.constant 0 : index
    %13 = vector.load %arg2[%c0_14, %c2, %c0_15, %c0_16] : memref<1x4x2x128xf32, #tpu.memory_space<vmem>>, vector<1x1x2x128xf32>
    %14 = vector.shape_cast %13 : vector<1x1x2x128xf32> to vector<2x128xf32>
    %c0_17 = arith.constant 0 : index
    %c2_18 = arith.constant 2 : index
    %c0_19 = arith.constant 0 : index
    %c0_20 = arith.constant 0 : index
    %15 = vector.load %arg3[%c0_17, %c2_18, %c0_19, %c0_20] : memref<3x4x1x128xf32, #tpu.memory_space<vmem>>, vector<1x1x1x128xf32>
    %16 = vector.shape_cast %15 : vector<1x1x1x128xf32> to vector<1x128xf32>
    %17 = vector.broadcast %16 : vector<1x128xf32> to vector<2x128xf32>
    %18 = arith.mulf %14, %17 : vector<2x128xf32>
    %19 = arith.addf %12, %18 : vector<2x128xf32>
    %c0_21 = arith.constant 0 : index
    %c3 = arith.constant 3 : index
    %c0_22 = arith.constant 0 : index
    %c0_23 = arith.constant 0 : index
    %20 = vector.load %arg2[%c0_21, %c3, %c0_22, %c0_23] : memref<1x4x2x128xf32, #tpu.memory_space<vmem>>, vector<1x1x2x128xf32>
    %21 = vector.shape_cast %20 : vector<1x1x2x128xf32> to vector<2x128xf32>
    %c0_24 = arith.constant 0 : index
    %c3_25 = arith.constant 3 : index
    %c0_26 = arith.constant 0 : index
    %c0_27 = arith.constant 0 : index
    %22 = vector.load %arg3[%c0_24, %c3_25, %c0_26, %c0_27] : memref<3x4x1x128xf32, #tpu.memory_space<vmem>>, vector<1x1x1x128xf32>
    %23 = vector.shape_cast %22 : vector<1x1x1x128xf32> to vector<1x128xf32>
    %24 = vector.broadcast %23 : vector<1x128xf32> to vector<2x128xf32>
    %25 = arith.mulf %21, %24 : vector<2x128xf32>
    %26 = arith.addf %19, %25 : vector<2x128xf32>
    %c0_28 = arith.constant 0 : index
    %c0_29 = arith.constant 0 : index
    %c0_30 = arith.constant 0 : index
    %27 = vector.load %arg4[%c0_28, %c0_29, %c0_30] : memref<3x1x128xf32, #tpu.memory_space<vmem>>, vector<1x1x128xf32>
    %28 = vector.shape_cast %27 : vector<1x1x128xf32> to vector<1x128xf32>
    %29 = vector.broadcast %28 : vector<1x128xf32> to vector<2x128xf32>
    %30 = arith.addf %26, %29 : vector<2x128xf32>
    %c0_31 = arith.constant 0 : index
    %c0_32 = arith.constant 0 : index
    %c0_33 = arith.constant 0 : index
    %c0_34 = arith.constant 0 : index
    %31 = vector.load %arg5[%c0_31, %c0_32, %c0_33, %c0_34] : memref<1x3x2x128xf32, #tpu.memory_space<vmem>>, vector<1x1x2x128xf32>
    %32 = vector.shape_cast %31 : vector<1x1x2x128xf32> to vector<2x128xf32>
    %33 = vector.shape_cast %30 : vector<2x128xf32> to vector<1x1x2x128xf32>
    tpu.vector_store %arg5[%c0_31, %c0_32, %c0_33, %c0_34], %33 {strides = array<i32>} : memref<1x3x2x128xf32, #tpu.memory_space<vmem>>, vector<1x1x2x128xf32>,
    %c0_35 = arith.constant 0 : index
    %c0_36 = arith.constant 0 : index
    %c0_37 = arith.constant 0 : index
    %c0_38 = arith.constant 0 : index
    %34 = vector.load %arg2[%c0_35, %c0_36, %c0_37, %c0_38] : memref<1x4x2x128xf32, #tpu.memory_space<vmem>>, vector<1x1x2x128xf32>
    %35 = vector.shape_cast %34 : vector<1x1x2x128xf32> to vector<2x128xf32>
    %c1_39 = arith.constant 1 : index
    %c0_40 = arith.constant 0 : index
    %c0_41 = arith.constant 0 : index
    %c0_42 = arith.constant 0 : index
    %36 = vector.load %arg3[%c1_39, %c0_40, %c0_41, %c0_42] : memref<3x4x1x128xf32, #tpu.memory_space<vmem>>, vector<1x1x1x128xf32>
    %37 = vector.shape_cast %36 : vector<1x1x1x128xf32> to vector<1x128xf32>
    %38 = vector.broadcast %37 : vector<1x128xf32> to vector<2x128xf32>
    %39 = arith.mulf %35, %38 : vector<2x128xf32>
    %c0_43 = arith.constant 0 : index
    %c1_44 = arith.constant 1 : index
    %c0_45 = arith.constant 0 : index
    %c0_46 = arith.constant 0 : index
    %40 = vector.load %arg2[%c0_43, %c1_44, %c0_45, %c0_46] : memref<1x4x2x128xf32, #tpu.memory_space<vmem>>, vector<1x1x2x128xf32>
    %41 = vector.shape_cast %40 : vector<1x1x2x128xf32> to vector<2x128xf32>
    %c1_47 = arith.constant 1 : index
    %c1_48 = arith.constant 1 : index
    %c0_49 = arith.constant 0 : index
    %c0_50 = arith.constant 0 : index
    %42 = vector.load %arg3[%c1_47, %c1_48, %c0_49, %c0_50] : memref<3x4x1x128xf32, #tpu.memory_space<vmem>>, vector<1x1x1x128xf32>
    %43 = vector.shape_cast %42 : vector<1x1x1x128xf32> to vector<1x128xf32>
    %44 = vector.broadcast %43 : vector<1x128xf32> to vector<2x128xf32>
    %45 = arith.mulf %41, %44 : vector<2x128xf32>
    %46 = arith.addf %39, %45 : vector<2x128xf32>
    %c0_51 = arith.constant 0 : index
    %c2_52 = arith.constant 2 : index
    %c0_53 = arith.constant 0 : index
    %c0_54 = arith.constant 0 : index
    %47 = vector.load %arg2[%c0_51, %c2_52, %c0_53, %c0_54] : memref<1x4x2x128xf32, #tpu.memory_space<vmem>>, vector<1x1x2x128xf32>
    %48 = vector.shape_cast %47 : vector<1x1x2x128xf32> to vector<2x128xf32>
    %c1_55 = arith.constant 1 : index
    %c2_56 = arith.constant 2 : index
    %c0_57 = arith.constant 0 : index
    %c0_58 = arith.constant 0 : index
    %49 = vector.load %arg3[%c1_55, %c2_56, %c0_57, %c0_58] : memref<3x4x1x128xf32, #tpu.memory_space<vmem>>, vector<1x1x1x128xf32>
    %50 = vector.shape_cast %49 : vector<1x1x1x128xf32> to vector<1x128xf32>
    %51 = vector.broadcast %50 : vector<1x128xf32> to vector<2x128xf32>
    %52 = arith.mulf %48, %51 : vector<2x128xf32>
    %53 = arith.addf %46, %52 : vector<2x128xf32>
    %c0_59 = arith.constant 0 : index
    %c3_60 = arith.constant 3 : index
    %c0_61 = arith.constant 0 : index
    %c0_62 = arith.constant 0 : index
    %54 = vector.load %arg2[%c0_59, %c3_60, %c0_61, %c0_62] : memref<1x4x2x128xf32, #tpu.memory_space<vmem>>, vector<1x1x2x128xf32>
    %55 = vector.shape_cast %54 : vector<1x1x2x128xf32> to vector<2x128xf32>
    %c1_63 = arith.constant 1 : index
    %c3_64 = arith.constant 3 : index
    %c0_65 = arith.constant 0 : index
    %c0_66 = arith.constant 0 : index
    %56 = vector.load %arg3[%c1_63, %c3_64, %c0_65, %c0_66] : memref<3x4x1x128xf32, #tpu.memory_space<vmem>>, vector<1x1x1x128xf32>
    %57 = vector.shape_cast %56 : vector<1x1x1x128xf32> to vector<1x128xf32>
    %58 = vector.broadcast %57 : vector<1x128xf32> to vector<2x128xf32>
    %59 = arith.mulf %55, %58 : vector<2x128xf32>
    %60 = arith.addf %53, %59 : vector<2x128xf32>
    %c1_67 = arith.constant 1 : index
    %c0_68 = arith.constant 0 : index
    %c0_69 = arith.constant 0 : index
    %61 = vector.load %arg4[%c1_67, %c0_68, %c0_69] : memref<3x1x128xf32, #tpu.memory_space<vmem>>, vector<1x1x128xf32>
    %62 = vector.shape_cast %61 : vector<1x1x128xf32> to vector<1x128xf32>
    %63 = vector.broadcast %62 : vector<1x128xf32> to vector<2x128xf32>
    %64 = arith.addf %60, %63 : vector<2x128xf32>
    %c0_70 = arith.constant 0 : index
    %c1_71 = arith.constant 1 : index
    %c0_72 = arith.constant 0 : index
    %c0_73 = arith.constant 0 : index
    %65 = vector.load %arg5[%c0_70, %c1_71, %c0_72, %c0_73] : memref<1x3x2x128xf32, #tpu.memory_space<vmem>>, vector<1x1x2x128xf32>
    %66 = vector.shape_cast %65 : vector<1x1x2x128xf32> to vector<2x128xf32>
    %67 = vector.shape_cast %64 : vector<2x128xf32> to vector<1x1x2x128xf32>
    tpu.vector_store %arg5[%c0_70, %c1_71, %c0_72, %c0_73], %67 {strides = array<i32>} : memref<1x3x2x128xf32, #tpu.memory_space<vmem>>, vector<1x1x2x128xf32>,
    %c0_74 = arith.constant 0 : index
    %c0_75 = arith.constant 0 : index
    %c0_76 = arith.constant 0 : index
    %c0_77 = arith.constant 0 : index
    %68 = vector.load %arg2[%c0_74, %c0_75, %c0_76, %c0_77] : memref<1x4x2x128xf32, #tpu.memory_space<vmem>>, vector<1x1x2x128xf32>
    %69 = vector.shape_cast %68 : vector<1x1x2x128xf32> to vector<2x128xf32>
    %c2_78 = arith.constant 2 : index
    %c0_79 = arith.constant 0 : index
    %c0_80 = arith.constant 0 : index
    %c0_81 = arith.constant 0 : index
    %70 = vector.load %arg3[%c2_78, %c0_79, %c0_80, %c0_81] : memref<3x4x1x128xf32, #tpu.memory_space<vmem>>, vector<1x1x1x128xf32>
    %71 = vector.shape_cast %70 : vector<1x1x1x128xf32> to vector<1x128xf32>
    %72 = vector.broadcast %71 : vector<1x128xf32> to vector<2x128xf32>
    %73 = arith.mulf %69, %72 : vector<2x128xf32>
    %c0_82 = arith.constant 0 : index
    %c1_83 = arith.constant 1 : index
    %c0_84 = arith.constant 0 : index
    %c0_85 = arith.constant 0 : index
    %74 = vector.load %arg2[%c0_82, %c1_83, %c0_84, %c0_85] : memref<1x4x2x128xf32, #tpu.memory_space<vmem>>, vector<1x1x2x128xf32>
    %75 = vector.shape_cast %74 : vector<1x1x2x128xf32> to vector<2x128xf32>
    %c2_86 = arith.constant 2 : index
    %c1_87 = arith.constant 1 : index
    %c0_88 = arith.constant 0 : index
    %c0_89 = arith.constant 0 : index
    %76 = vector.load %arg3[%c2_86, %c1_87, %c0_88, %c0_89] : memref<3x4x1x128xf32, #tpu.memory_space<vmem>>, vector<1x1x1x128xf32>
    %77 = vector.shape_cast %76 : vector<1x1x1x128xf32> to vector<1x128xf32>
    %78 = vector.broadcast %77 : vector<1x128xf32> to vector<2x128xf32>
    %79 = arith.mulf %75, %78 : vector<2x128xf32>
    %80 = arith.addf %73, %79 : vector<2x128xf32>
    %c0_90 = arith.constant 0 : index
    %c2_91 = arith.constant 2 : index
    %c0_92 = arith.constant 0 : index
    %c0_93 = arith.constant 0 : index
    %81 = vector.load %arg2[%c0_90, %c2_91, %c0_92, %c0_93] : memref<1x4x2x128xf32, #tpu.memory_space<vmem>>, vector<1x1x2x128xf32>
    %82 = vector.shape_cast %81 : vector<1x1x2x128xf32> to vector<2x128xf32>
    %c2_94 = arith.constant 2 : index
    %c2_95 = arith.constant 2 : index
    %c0_96 = arith.constant 0 : index
    %c0_97 = arith.constant 0 : index
    %83 = vector.load %arg3[%c2_94, %c2_95, %c0_96, %c0_97] : memref<3x4x1x128xf32, #tpu.memory_space<vmem>>, vector<1x1x1x128xf32>
    %84 = vector.shape_cast %83 : vector<1x1x1x128xf32> to vector<1x128xf32>
    %85 = vector.broadcast %84 : vector<1x128xf32> to vector<2x128xf32>
    %86 = arith.mulf %82, %85 : vector<2x128xf32>
    %87 = arith.addf %80, %86 : vector<2x128xf32>
    %c0_98 = arith.constant 0 : index
    %c3_99 = arith.constant 3 : index
    %c0_100 = arith.constant 0 : index
    %c0_101 = arith.constant 0 : index
    %88 = vector.load %arg2[%c0_98, %c3_99, %c0_100, %c0_101] : memref<1x4x2x128xf32, #tpu.memory_space<vmem>>, vector<1x1x2x128xf32>
    %89 = vector.shape_cast %88 : vector<1x1x2x128xf32> to vector<2x128xf32>
    %c2_102 = arith.constant 2 : index
    %c3_103 = arith.constant 3 : index
    %c0_104 = arith.constant 0 : index
    %c0_105 = arith.constant 0 : index
    %90 = vector.load %arg3[%c2_102, %c3_103, %c0_104, %c0_105] : memref<3x4x1x128xf32, #tpu.memory_space<vmem>>, vector<1x1x1x128xf32>
    %91 = vector.shape_cast %90 : vector<1x1x1x128xf32> to vector<1x128xf32>
    %92 = vector.broadcast %91 : vector<1x128xf32> to vector<2x128xf32>
    %93 = arith.mulf %89, %92 : vector<2x128xf32>
    %94 = arith.addf %87, %93 : vector<2x128xf32>
    %c2_106 = arith.constant 2 : index
    %c0_107 = arith.constant 0 : index
    %c0_108 = arith.constant 0 : index
    %95 = vector.load %arg4[%c2_106, %c0_107, %c0_108] : memref<3x1x128xf32, #tpu.memory_space<vmem>>, vector<1x1x128xf32>
    %96 = vector.shape_cast %95 : vector<1x1x128xf32> to vector<1x128xf32>
    %97 = vector.broadcast %96 : vector<1x128xf32> to vector<2x128xf32>
    %98 = arith.addf %94, %97 : vector<2x128xf32>
    %c0_109 = arith.constant 0 : index
    %c2_110 = arith.constant 2 : index
    %c0_111 = arith.constant 0 : index
    %c0_112 = arith.constant 0 : index
    %99 = vector.load %arg5[%c0_109, %c2_110, %c0_111, %c0_112] : memref<1x3x2x128xf32, #tpu.memory_space<vmem>>, vector<1x1x2x128xf32>
    %100 = vector.shape_cast %99 : vector<1x1x2x128xf32> to vector<2x128xf32>
    %101 = vector.shape_cast %98 : vector<2x128xf32> to vector<1x1x2x128xf32>
    tpu.vector_store %arg5[%c0_109, %c2_110, %c0_111, %c0_112], %101 {strides = array<i32>} : memref<1x3x2x128xf32, #tpu.memory_space<vmem>>, vector<1x1x2x128xf32>,
    return
  }
  func.func @transform_0(%arg0: i32, %arg1: i32) -> (i32, i32, i32, i32) {
    %c0_i32 = arith.constant 0 : i32
    %c0_i32_0 = arith.constant 0 : i32
    %c0_i32_1 = arith.constant 0 : i32
    return %arg0, %c0_i32, %arg1, %c0_i32_0 : i32, i32, i32, i32
  }
  func.func @transform_1(%arg0: i32, %arg1: i32) -> (i32, i32, i32, i32) {
    %c0_i32 = arith.constant 0 : i32
    %c0_i32_0 = arith.constant 0 : i32
    %c0_i32_1 = arith.constant 0 : i32
    %c0_i32_2 = arith.constant 0 : i32
    %c0_i32_3 = arith.constant 0 : i32
    return %c0_i32, %c0_i32_0, %c0_i32_1, %c0_i32_2 : i32, i32, i32, i32
  }
  func.func @transform_2(%arg0: i32, %arg1: i32) -> (i32, i32, i32) {
    %c0_i32 = arith.constant 0 : i32
    %c0_i32_0 = arith.constant 0 : i32
    %c0_i32_1 = arith.constant 0 : i32
    %c0_i32_2 = arith.constant 0 : i32
    return %c0_i32, %c0_i32_0, %c0_i32_1 : i32, i32, i32
  }
  func.func @transform_3(%arg0: i32, %arg1: i32) -> (i32, i32, i32, i32) {
    %c0_i32 = arith.constant 0 : i32
    %c0_i32_0 = arith.constant 0 : i32
    %c0_i32_1 = arith.constant 0 : i32
    return %arg0, %c0_i32, %arg1, %c0_i32_0 : i32, i32, i32, i32
  }
}

</mosaic_0001>

<bundles_post_ra>
// kernel: tpu_custom_call.1
= control target key start
LH: loop header
LB: loop body
LE: loop exit
PB: predicated region body
PF: predicated region fallthrough
CT: control target
= control target key end

     0   :  { %s990_s0 = inlined_call_operand.hbm [shape: f32[2,4,2,128], index: 0, kind: input, shape index: {}]   ;;  %s991_s1 = inlined_call_operand.hbm [shape: f32[3,4,1,128], index: 1, kind: input, shape index: {}]   ;;  %s992_s2 = inlined_call_operand.hbm [shape: f32[3,1,128], index: 2, kind: input, shape index: {}]   ;;  %s993_s3 = inlined_call_operand.hbm [shape: f32[2,3,2,128], index: 3, kind: output, shape index: {}]  }
   0x1   :  { %994 = sst [smem:[#allocation12_spill]] %s991_s1 }
   0x2   :  { %8 = vsyncpa [#allocation3], 0 }
   0x3   :  { %10 = vsyncpa [#allocation3 + $0x1], 0 }
   0x4   :  { %11 = vsyncpa [#allocation6], 0 }
   0x5   :  { %12 = vsyncpa [#allocation4], 0 }
   0x6   :  { %14 = vsyncpa [#allocation4 + $0x1], 0  ;;  %s819_s12 = smov 0   ;;  %s821_s13 = smov 0  }
   0x7   :  { %s823_s14 = smov 0   ;;  %s825_s15 = smov 0  }
   0x8   :  { %s827_s16 = smov 0   ;;  %s829_s17 = smov 0  }
   0x9 LB: > { %s479_s18 = sadd.s32 4294967295, %s789_s17   ;;  %s480_s19 = sadd.s32 4294967294, %s789_s17   ;;  %s789_s17 = sphi %s829_s17, %s20_s17   ;;  %s785_s16 = sphi %s827_s16, %s1007_s16   ;;  %s781_s15 = sphi %s825_s15, %s1006_s15   ;;  %s777_s14 = sphi %s823_s14, %s1005_s14   ;;  %s773_s13 = sphi %s821_s13, %s1004_s13   ;;  %s769_s12 = sphi %s819_s12, %s1003_s12  }
   0xa   : > { %p54_p0 = scmp.ne.s32.totalorder %s773_s13, %s769_s12  ;;  %p853_p1 = scmp.eq.s32.totalorder %s479_s18, 0 }
   0xb   : > { %p857_p2 = scmp.eq.s32.totalorder %s479_s18, 1  ;;  %p128_p3 = scmp.eq.s32.totalorder %s480_s19, 1 }
   0xc   : > { %p863_p4 = por %p853_p1, %p54_p0  ;;  %p481_p5 = scmp.ge.s32.totalorder %s789_s17, 1 }
   0xd   : > { %p868_p6 = por %p128_p3, %p54_p0  ;;  %p135_p7 = scmp.lt.s32.totalorder %s789_s17, 3 }
   0xe   : > { %s999_s1 = sld [smem:[#allocation12_spill]]  ;;  %s791_s28 = smov [#allocation5]  }
   0xf   : > { %p876_p8 = pnand %p481_p5, %p135_p7  ;;  %s148_s29 = sshll.u32 %s791_s28, 4  ;;  %s149_s29 = int_to_ptr.vmem [resolvable:$true] %s148_s29 }
  0x10   : > { %p484_p11 = scmp.ge.s32.totalorder %s789_s17, 2  ;;  %s160_s5 = sshll.u32 %s992_s2, 4  ;;  %s161_s5 = int_to_ptr.hbm [resolvable:$true] %s160_s5 }
  0x11   : > { %p521_p9 = pneg %p876_p8  ;;  %s792_s6 = smov 16  }
  0x12   : > { %s793_s7 = smov 1   ;;  %s794_s8 = smov [#allocation7]  }
  0x13   : > { %p522_p10 = pnand %p521_p9, %p853_p1  ;;  %s162_s9 = sshll.u32 %s794_s8, 4  ;;  %s163_s9 = int_to_ptr.vmem [resolvable:$true] %s162_s9 }
  0x14   : > { %s146_s26 = sshll.u32 %s999_s1, 4  ;;  %s32_s10 = sadd.s32 1, %s785_s16  ;;  %s147_s26 = int_to_ptr.hbm [resolvable:$true] %s146_s26 }
  0x15   : > { %524 = dma.hbm_to_vmem [thread:$0]  (!%p522_p10), %s147_s26, 192, %s149_s29, [#allocation6], %s792_s6, %s792_s6, %s793_s7  }
  0x16   : > { %527 = dma.hbm_to_vmem [thread:$0]  (!%p522_p10), %s161_s5, 48, %s163_s9, [#allocation6], %s792_s6, %s792_s6, %s793_s7  }
  0x17   : > { %s41_s11 = sadd.s32 1, %s777_s14  ;;  %p34_p12 = scmp.ge.s32.totalorder %s32_s10, 2 }
  0x18   : > { %p48_p13 = scmp.ne.s32.totalorder %s777_s14, %s773_s13  ;;  %p49_p0 = scmp.eq.s32.totalorder %s789_s17, 0 }
  0x19   : > { %p538_p3 = scmp.lt.s32.totalorder %s789_s17, 2  ;;  %s1009_s10 = smov (%p34_p12, %s32_s10), 0 }
  0x1a   : > { %p896_p5 = por %p49_p0, %p48_p13  ;;  %p902_p7 = por %p857_p2, %p48_p13 }
  0x1b   : > { %s36_s24 = ssub.s32 %s785_s16, %s1009_s10  ;;  %s176_s25 = sand.u32 1, %s777_s14  }
  0x1c   : > { %p39_p9 = scmp.eq.s32.totalorder %s36_s24, 0  ;;  %s485_s26 = sshll.u32 %s176_s25, 3 }
  0x1d   : > { %s506_s28 = sshll.u32 %s785_s16, 3  ;;  %s180_s7 = scalar_lea.vmem [#allocation2], %s485_s26 }
  0x1e   : > { %s911_s29 = scalar_select %p39_p9, %s777_s14, %s41_s11  }
  0x1f   : > { %s186_s5 = scalar_lea.hbm %s990_s0, %s506_s28  ;;  %s189_s8 = sshll.u32 %s180_s7, 4  ;;  %s190_s8 = int_to_ptr.vmem [resolvable:$true] %s189_s8 }
  0x20   : > { %s187_s6 = sshll.u32 %s186_s5, 4  ;;  %p529_p2 = pnand %p538_p3, %p896_p5  ;;  %s188_s6 = int_to_ptr.hbm [resolvable:$true] %s187_s6 }
  0x21   : > { %s177_s21 = scalar_lea.sflag [#allocation3], %s176_s25  ;;  %s795_s9 = smov 32  }
  0x22   : > { %s796_s1 = smov 2   ;;  %201 = sbr.rel (%p876_p8) target bundleno = 66 (0x42), region = 32 }
  0x23   : > { %531 = dma.hbm_to_vmem [thread:$0]  (!%p529_p2), %s188_s6, 128, %s190_s8, %s177_s21, %s795_s9, %s795_s9, %s796_s1  }
  0x24   : > { %s923_s11 = sand.u32 (!%p876_p8), 1, %s773_s13  }
  0x25   : > { %s489_s24 = sshll.u32 (!%p876_p8), %s923_s11, 3  ;;  %s204_s26 = scalar_lea.sflag (!%p876_p8), [#allocation3], %s923_s11 }
  0x26   : > { %s927_s28 = scalar_lea.vmem (!%p876_p8), [#allocation2], %s489_s24 }
  0x27   : > { %756 = dma.done.wait (%p863_p4), %s204_s26, 128  }
  0x28   : > { %758 = vsyncadd (%p863_p4), %s204_s26, 4294967168 }
  0x29   : > { %760 = dma.done.wait (%p853_p1), [#allocation6], 240  }
  0x2a   : > { %762 = vsyncadd (%p853_p1), [#allocation6], 4294967056  ;;  %v241_v0 = vld [vmem:[%s927_s28] sm:$0x3]  ;;  %v598_v1 = vld [vmem:[#allocation5] ss:$0 sm:$0xff] }
  0x2b   : > { %v492_v2 = vld [vmem:[%s927_s28 + $0x2] sm:$0x3]  ;;  %v599_v3 = vld [vmem:[#allocation5 + $0x1] ss:$0 sm:$0xff]  ;;  %v246_v4 = vmul.f32 %v598_v1, %v241_v0  ;;  %v493_v5 = vld [vmem:[%s927_s28 + $0x4] sm:$0x3] }
  0x2c   : > { %v600_v6 = vld [vmem:[#allocation5 + $0x2] ss:$0 sm:$0xff]  ;;  %v254_v7 = vmul.f32 %v599_v3, %v492_v2  ;;  %v494_v8 = vld [vmem:[%s927_s28 + $0x6] sm:$0x3]  ;;  %v601_v9 = vld [vmem:[#allocation5 + $0x3] ss:$0 sm:$0xff] }
  0x2d   : > { %s507_s1 = smul.u32 6, %s923_s11  ;;  %v263_v10 = vmul.f32 %v600_v6, %v493_v5  ;;  %v280_v11 = vld [vmem:[%s927_s28] sm:$0x3]  ;;  %v272_v13 = vmul.f32 %v601_v9, %v494_v8  ;;  %v602_v14 = vld [vmem:[#allocation7] ss:$0 sm:$0xff]  ;;  %s359_s4 = scalar_lea.sflag [#allocation4], %s923_s11 }
  0x2e   : > { %v255_v12 = vadd.f32 %v254_v7, %v246_v4  ;;  %v603_v15 = vld [vmem:[#allocation5 + $0x4] ss:$0 sm:$0xff]  ;;  %v495_v16 = vld [vmem:[%s927_s28 + $0x2] sm:$0x3]  ;;  %v604_v17 = vld [vmem:[#allocation5 + $0x5] ss:$0 sm:$0xff] }
  0x2f   : > { %v496_v18 = vld [vmem:[%s927_s28 + $0x4] sm:$0x3]  ;;  %v286_v20 = vmul.f32 %v603_v15, %v280_v11  ;;  %v605_v21 = vld [vmem:[#allocation5 + $0x6] ss:$0 sm:$0xff]  ;;  %v497_v22 = vld [vmem:[%s927_s28 + $0x6] sm:$0x3]  ;;  %v293_v23 = vmul.f32 %v604_v17, %v495_v16 }
  0x30   : > { %v264_v19 = vadd.f32 %v263_v10, %v255_v12  ;;  %v606_v24 = vld [vmem:[#allocation5 + $0x7] ss:$0 sm:$0xff]  ;;  %v301_v26 = vmul.f32 %v605_v21, %v496_v18  ;;  %v319_v27 = vld [vmem:[%s927_s28] sm:$0x3]  ;;  %s508_s20 = smul.u32 6, %s781_s15  ;;  %s240_s22 = scalar_lea.vmem [#allocation8], %s507_s1 }
  0x31   : > { %v294_v28 = vadd.f32 %v293_v23, %v286_v20  ;;  %v309_v29 = vmul.f32 %v606_v24, %v497_v22  ;;  %v607_v30 = vld [vmem:[#allocation7 + $0x1] ss:$0 sm:$0xff]  ;;  %v608_v31 = vld [vmem:[#allocation5 + $0x8] ss:$0 sm:$0xff]  ;;  %v499_v32 = vld [vmem:[%s927_s28 + $0x2] sm:$0x3] }
  0x32   : > { %v273_v25 = vadd.f32 %v272_v13, %v264_v19  ;;  %v609_v34 = vld [vmem:[#allocation5 + $0x9] ss:$0 sm:$0xff]  ;;  %v500_v35 = vld [vmem:[%s927_s28 + $0x4] sm:$0x3]  ;;  %v325_v37 = vmul.f32 %v608_v31, %v319_v27  ;;  %v610_v38 = vld [vmem:[#allocation5 + $0xa] ss:$0 sm:$0xff]  ;;  %s371_s18 = scalar_lea.hbm %s993_s3, %s508_s20 }
  0x33   : > { %v302_v36 = vadd.f32 %v301_v26, %v294_v28  ;;  %v501_v39 = vld [vmem:[%s927_s28 + $0x6] sm:$0x3]  ;;  %v332_v40 = vmul.f32 %v609_v34, %v499_v32  ;;  %v611_v41 = vld [vmem:[#allocation5 + $0xb] ss:$0 sm:$0xff]  ;;  %v340_v43 = vmul.f32 %v610_v38, %v500_v35  ;;  %v612_v48 = vld [vmem:[#allocation7 + $0x2] ss:$0 sm:$0xff] }
  0x34   : > { %v278_v33 = vadd.f32 %v602_v14, %v273_v25  ;;  %v348_v45 = vmul.f32 %v611_v41, %v501_v39  ;;  %s372_s25 = sshll.u32 %s240_s22, 4  ;;  %s374_s30 = sshll.u32 %s371_s18, 4  ;;  %s373_s25 = int_to_ptr.vmem [resolvable:$true] %s372_s25  ;;  %s375_s30 = int_to_ptr.hbm [resolvable:$true] %s374_s30 }
  0x35   : > { %v310_v42 = vadd.f32 %v309_v29, %v302_v36  ;;  %v333_v44 = vadd.f32 %v332_v40, %v325_v37  ;;  %s717_s5 = sshra.s32 %s375_s30, 4  ;;  %s723_s21 = scalar_lea.hbm %s993_s3, 12  ;;  %s718_s5 = int_to_ptr.hbm [resolvable:$true] %s717_s5 }
  0x36   : > { %279 = vst [vmem:[%s240_s22] sm:$0x3] %v278_v33  ;;  %s719_s6 = scalar_lea.hbm %s718_s5, 6  ;;  %p724_p10 = scmp.lt.s32.totalorder %s718_s5, %s993_s3 }
  0x37   : > { %v316_v46 = vadd.f32 %v607_v30, %v310_v42  ;;  %v341_v47 = vadd.f32 %v340_v43, %v333_v44  ;;  %p720_p1 = scmp.ne.s32.totalorder %s718_s5, %s719_s6  ;;  %p725_p12 = scmp.lt.s32.totalorder %s723_s21, %s719_s6 }
  0x39   : > { %498 = vst [vmem:[%s240_s22 + $0x2] sm:$0x3] %v316_v46  ;;  %v349_v49 = vadd.f32 %v348_v45, %v341_v47  ;;  %p721_p4 = pnand %p720_p1, %p902_p7  ;;  %p726_p13 = por %p725_p12, %p724_p10 }
  0x3b   : > { %v355_v50 = vadd.f32 %v612_v48, %v349_v49  ;;  %p722_p8 = pneg %p721_p4 }
  0x3d   : > { %502 = vst [vmem:[%s240_s22 + $0x4] sm:$0x3] %v355_v50  ;;  %p727_p0 = pnand %p726_p13, %p722_p8 }
  0x3f   : > { %730 = shalt.err (!%p727_p0)
}
  0x40   : > { %s797_s11 = smov 32   ;;  %s798_s26 = smov 2  }
  0x41   : > { %519 = dma.vmem_to_hbm [thread:$0]  (%p902_p7), %s373_s25, 96, %s375_s30, %s359_s4, %s797_s11, %s797_s11, %s798_s26  }
  0x42 PF: > { %s389_s28 = sand.u32 1, %s769_s12   ;;  %p533_p3 = pnand %p484_p11, %p868_p6 }
  0x43   : > { %s390_s1 = scalar_lea.sflag [#allocation4], %s389_s28 }
  0x44   : > { %p534_p5 = pneg %p533_p3 }
  0x46   : > { %764 = dma.done.wait (%p534_p5), %s390_s1, 96  }
  0x47   : > { %766 = vsyncadd (%p534_p5), %s390_s1, 4294967200  ;;  %s20_s17 = sadd.s32 1, %s789_s17   ;;  %s1003_s12 = smov %s773_s13 }
  0x48   : > { %p17_p9 = scmp.ge.s32.totalorder %s20_s17, 4   ;;  %s1004_s13 = smov %s777_s14 }
  0x49   : > { %s1005_s14 = smov %s911_s29  ;;  %s1006_s15 = smov %s785_s16 }
  0x4a   : > { %s1007_s16 = smov %s1009_s10  ;;  %19 = sbr.rel (!%p17_p9) target bundleno = 9 (0x9), region = 103 }
  0x4f   :  { %396 = vsyncpa [#allocation3], 1 }
  0x50   :  { %398 = vsyncpa [#allocation3 + $0x1], 1 }
  0x51   :  { %399 = vsyncpa [#allocation6], 1 }
  0x52   :  { %400 = vsyncpa [#allocation4], 1 }
  0x53   :  { %402 = vsyncpa [#allocation4 + $0x1], 1 }

</bundles_post_ra>
